<compile_context>
chip_gen: v7x
topology: tpu7x:2x2x1
jax: 0.10.0
libtpu: 0.0.40
codegen_flags: <defaults>
</compile_context>

<pallas_src>
import functools

import jax
import jax.numpy as jnp
from jax import lax
from jax.experimental import pallas as pl
from jax.experimental.pallas import tpu as pltpu


def _round_up(x, m):
    return -(-x // m) * m


def _vmem_capacity_bytes():
    try:
        return int(pltpu.get_tpu_info().vmem_capacity_bytes)
    except Exception:
        return 64 * 1024 * 1024  # v7x-safe fallback


def _pick_tile(total, min_tiles, cap):
    """Largest multiple-of-128 divisor of `total` <= cap yielding >= min_tiles
    tiles; falls back to 128 (always a divisor since total is 128-padded)."""
    best = 128
    t = 128
    limit = min(total, max(cap, 128))
    while t <= limit:
        if total % t == 0 and total // t >= min_tiles:
            best = t
        t += 128
    return best


def pack_convlstm_params(w_i, b_i, w_f, b_f, w_g, b_g, w_o, b_o):
    """Fuse the four gate convs into one packed matrix, done ONCE per module
    (hoisted out of the per-timestep path).

    Gate row order is [i, f, o, g] so the three sigmoid gates form one
    contiguous sublane slab in the kernel.  Columns are (kh*K+kw)*2C + c_in,
    followed by the bias column, zero-padded to a multiple of 8."""
    w = jnp.concatenate([w_i, w_f, w_o, w_g], axis=0).astype(jnp.float32)
    b = jnp.concatenate([b_i, b_f, b_o, b_g], axis=0).astype(jnp.float32)
    OC, IC, K, K2 = w.shape
    assert K == K2
    KK2C = K * K * IC
    KKP = _round_up(KK2C + 1, 8)
    w2 = jnp.transpose(w, (0, 2, 3, 1)).reshape(OC, KK2C)
    packed = jnp.zeros((OC, KKP), jnp.float32)
    packed = packed.at[:, :KK2C].set(w2).at[:, KK2C].set(b)
    return packed


def conv_lstm_pallas(xh, c, w_packed, *, kernel_size):
    """xh: (B, 2C, H, W); c: (B, C, H, W); w_packed: output of
    pack_convlstm_params.  Returns (h, c_new) in NCHW."""
    K = kernel_size
    assert K % 2 == 1, "reflect 'same' conv matches torch only for odd K"
    pad = K // 2
    B, C2, H, W = xh.shape
    C = C2 // 2
    assert C2 == 2 * C
    assert pad < H and pad < W, "reflect padding requires pad < spatial dims"
    KK2C = K * K * C2
    KKP = _round_up(KK2C + 1, 8)
    assert w_packed.shape == (4 * C, KKP)

    Hp, Wp = H + 2 * pad, W + 2 * pad
    P = Hp * Wp                              # padded canvas = output canvas
    halo = pad * (Wp + 1)                    # max |flat tap shift|
    Pout = _round_up(P, 128)                 # lane-padded output canvas

    # Batch packing so the epilogue runs on full 8-sublane vregs.
    Bb = max(1, -(-8 // C))
    Bp = _round_up(B, Bb)
    nbg = Bp // Bb

    # ---- generation-aware spatial tile / VMEM budget ------------------------
    vmem_cap = _vmem_capacity_bytes()
    halo_pad = _round_up(2 * halo, 128) + 128          # bound on (Tw - T)
    fixed = 4 * (2 * Bb * C2 * halo_pad + 2 * 4 * C * KKP)
    per_lane = 4 * (2 * Bb * C2          # x window (double-buffered)
                    + Bb * KKP           # xcol scratch
                    + 2 * Bb * C         # c block (double-buffered)
                    + 4 * Bb * C         # h, cn blocks (double-buffered)
                    + 8 * Bb * C)        # epilogue temporaries
    avail = int(vmem_cap * 0.6) - fixed
    cap = max(128, (avail // per_lane) // 128 * 128) if avail > 0 else 128
    min_tiles = 2 if nbg == 1 else 1     # let v7x megacore split the grid
    T = _pick_tile(Pout, min_tiles, cap)
    num_t = Pout // T
    Tw = _round_up(T + 2 * halo, 128)    # window width incl. +/- halo
    Xlen = (num_t - 1) * T + Tw

    f32 = jnp.float32
    # ---- inputs: reflect-pad x, flatten, halo-embed, cut halo'd windows -----
    xp = jnp.pad(xh.astype(f32), ((0, 0), (0, 0), (pad, pad), (pad, pad)),
                 mode="reflect").reshape(B, C2, P)
    xg = jnp.pad(xp, ((0, Bp - B), (0, 0), (halo, Xlen - P - halo)))
    xg = xg.reshape(nbg, Bb * C2, Xlen)
    # TODO(synk): for very large images replace this window materialization by
    # manual halo DMA (memory_space=pl.ANY + pltpu.make_async_copy).
    xwin = jnp.stack([xg[:, :, r * T:r * T + Tw] for r in range(num_t)],
                     axis=1)                              # (nbg, num_t, Bb*2C, Tw)

    # c embedded into the same padded canvas (zeros on the ring), batch-grouped.
    cb = jnp.pad(c.astype(f32), ((0, Bp - B), (0, 0), (pad, pad), (pad, pad)))
    cb = cb.reshape(Bp, C, P)
    cb = jnp.pad(cb, ((0, 0), (0, 0), (0, Pout - P))).reshape(nbg, Bb * C, Pout)

    BC = Bb * C

    def kernel(x_ref, w_ref, c_ref, h_ref, cn_ref, xcol_ref):
        # x_ref   : (Bb*2C, Tw)   halo'd input window (lane-dense spatial)
        # w_ref   : (4C, KKP)     fused [i,f,o,g] weights, bias folded in
        # c_ref   : (Bb*C, T)     previous cell state
        # h_ref   : (Bb*C, T)     hidden state out
        # cn_ref  : (Bb*C, T)     new cell state out
        # xcol_ref: (Bb, KKP, T)  per-batch im2col scratch
        w = w_ref[...]
        tail_rows = KKP - KK2C
        row_ids = lax.broadcasted_iota(jnp.int32, (tail_rows, T), 0)
        tail = jnp.where(row_ids == 0, 1.0, 0.0).astype(f32)   # ones row + zero pad

        accs = []
        for bi in range(Bb):
            r0 = bi * C2
            for kh in range(K):
                for kw in range(K):
                    tap = kh * K + kw
                    off = kh * Wp + kw                 # static flat tap shift
                    xcol_ref[bi, tap * C2:(tap + 1) * C2, :] = (
                        x_ref[r0:r0 + C2, off:off + T])
            xcol_ref[bi, KK2C:KKP, :] = tail
            # single fused MXU contraction over all taps + channels + bias
            accs.append(jnp.dot(w, xcol_ref[bi],
                                preferred_element_type=f32))   # (4C, T)

        # gate-major restack across packed batches -> full 8-sublane vregs:
        # rows = [i_b0..i_bBb | f_* | o_* | g_*], each gate C rows per batch.
        pre = jnp.concatenate(
            [accs[b][gi * C:(gi + 1) * C, :]
             for gi in range(4) for b in range(Bb)], axis=0)   # (4*Bb*C, T)

        # one fused sigmoid (tanh form: 1 EUP push instead of exp+recip) for
        # the contiguous [i, f, o] slab; one tanh for g.
        sig = jnp.tanh(pre[:3 * BC, :] * 0.5) * 0.5 + 0.5
        g_gate = jnp.tanh(pre[3 * BC:, :])
        i_g = sig[:BC]
        f_g = sig[BC:2 * BC]
        o_g = sig[2 * BC:3 * BC]

        c_new = f_g * c_ref[...] + i_g * g_gate
        h = o_g * jnp.tanh(c_new)
        cn_ref[...] = c_new.astype(cn_ref.dtype)
        h_ref[...] = h.astype(h_ref.dtype)

    h_g, cn_g = pl.pallas_call(
        kernel,
        out_shape=(jax.ShapeDtypeStruct((nbg, BC, Pout), xh.dtype),
                   jax.ShapeDtypeStruct((nbg, BC, Pout), xh.dtype)),
        grid_spec=pltpu.PrefetchScalarGridSpec(
            num_scalar_prefetch=0,
            grid=(nbg, num_t),
            in_specs=[
                pl.BlockSpec((None, None, Bb * C2, Tw), lambda b, t: (b, t, 0, 0)),
                pl.BlockSpec((4 * C, KKP), lambda b, t: (0, 0)),
                pl.BlockSpec((None, BC, T), lambda b, t: (b, 0, t)),
            ],
            out_specs=[
                pl.BlockSpec((None, BC, T), lambda b, t: (b, 0, t)),
                pl.BlockSpec((None, BC, T), lambda b, t: (b, 0, t)),
            ],
            scratch_shapes=[pltpu.VMEM((Bb, KKP, T), jnp.float32)],
        ),
        compiler_params=pltpu.CompilerParams(
            dimension_semantics=("parallel", "parallel"),
            vmem_limit_bytes=int(vmem_cap * 3 // 4),
        ),
    )(xwin, w_packed.astype(f32), cb)

    def crop(y):
        y = y.reshape(Bp, C, Pout)[:B, :, :P].reshape(B, C, Hp, Wp)
        return y[:, :, pad:pad + H, pad:pad + W]

    return crop(h_g), crop(cn_g)


def conv_lstm_reference(xh, c, w_i, b_i, w_f, b_f, w_g, b_g, w_o, b_o, K):
    """Pure-JAX reference matching the PyTorch module (NCHW)."""
    pad = K // 2
    xp = jnp.pad(xh, ((0, 0), (0, 0), (pad, pad), (pad, pad)), mode="reflect")

    def conv(w, b):
        y = lax.conv_general_dilated(
            xp, w, window_strides=(1, 1), padding="VALID",
            dimension_numbers=("NCHW", "OIHW", "NCHW"))
        return y + b[None, :, None, None]

    i = jax.nn.sigmoid(conv(w_i, b_i))
    f = jax.nn.sigmoid(conv(w_f, b_f))
    g = jnp.tanh(conv(w_g, b_g))
    o = jax.nn.sigmoid(conv(w_o, b_o))
    c_new = f * c + i * g
    h = o * jnp.tanh(c_new)
    return h, c_new


if __name__ == "__main__":
    # Small deterministic setup: in_channels=4, kernel_size=3, batch=2, 16x16
    B, C, H, W, K = 2, 4, 16, 16, 3

    key = jax.random.PRNGKey(0)
    keys = jax.random.split(key, 10)

    xh = jax.random.normal(keys[0], (B, 2 * C, H, W), dtype=jnp.float32)
    c0 = jax.random.normal(keys[1], (B, C, H, W), dtype=jnp.float32)

    def mk_w(k):
        return 0.1 * jax.random.normal(k, (C, 2 * C, K, K), dtype=jnp.float32)

    def mk_b(k):
        return 0.1 * jax.random.normal(k, (C,), dtype=jnp.float32)

    w_i, w_f, w_g, w_o = mk_w(keys[2]), mk_w(keys[3]), mk_w(keys[4]), mk_w(keys[5])
    b_i, b_f, b_g, b_o = mk_b(keys[6]), mk_b(keys[7]), mk_b(keys[8]), mk_b(keys[9])

    # Hoisted, once-per-module parameter repack (perf review item).
    w_packed = pack_convlstm_params(w_i, b_i, w_f, b_f, w_g, b_g, w_o, b_o)

    fwd = jax.jit(functools.partial(conv_lstm_pallas, kernel_size=K))
    h_out, c_out = fwd(xh, c0, w_packed)
    h_out, c_out = jax.block_until_ready((h_out, c_out))

    h_ref, c_ref = conv_lstm_reference(
        xh, c0, w_i, b_i, w_f, b_f, w_g, b_g, w_o, b_o, K)

    assert h_out.shape == (B, C, H, W) and c_out.shape == (B, C, H, W)
    assert jnp.allclose(h_out, h_ref, atol=1e-4, rtol=1e-4)
    assert jnp.allclose(c_out, c_ref, atol=1e-4, rtol=1e-4)

    print("KERNEL_OK")
</pallas_src>

<mosaic_0001>
module attributes {stable_mosaic.version = 11 : i64} {
  func.func @kernel(%arg0: i32, %arg1: i32, %arg2: memref<1x1x16x256xf32, #tpu.memory_space<vmem>>, %arg3: memref<16x80xf32, #tpu.memory_space<vmem>>, %arg4: memref<1x8x128xf32, #tpu.memory_space<vmem>>, %arg5: memref<1x8x128xf32, #tpu.memory_space<vmem>>, %arg6: memref<1x8x128xf32, #tpu.memory_space<vmem>>, %arg7: memref<2x80x128xf32, #tpu.memory_space<vmem>>) attributes {dimension_semantics = [#tpu.dimension_semantics<parallel>, #tpu.dimension_semantics<parallel>], iteration_bounds = array<i64: 1, 3>, scalar_prefetch = 0 : i64, scratch_operands = 1 : i64, tpu.core_type = #tpu.core_type<tc>, window_params = [{transform_indices = @transform_0, window_bounds = array<i64: 1, 1, 16, 256>}, {pipeline_mode = #tpu.pipeline_mode<synchronous>, transform_indices = @transform_1, window_bounds = array<i64: 16, 80>}, {transform_indices = @transform_2, window_bounds = array<i64: 1, 8, 128>}, {transform_indices = @transform_3, window_bounds = array<i64: 1, 8, 128>}, {transform_indices = @transform_4, window_bounds = array<i64: 1, 8, 128>}]} {
    %c0 = arith.constant 0 : index
    %c0_0 = arith.constant 0 : index
    %0 = vector.load %arg3[%c0, %c0_0] : memref<16x80xf32, #tpu.memory_space<vmem>>, vector<16x80xf32>
    %1 = tpu.iota {dimensions = array<i32: 0>} : vector<8x128xi32>
    %c0_i32 = arith.constant 0 : i32
    %2 = vector.broadcast %c0_i32 : i32 to vector<8x128xi32>
    %3 = arith.cmpi eq, %1, %2 : vector<8x128xi32>
    %cst = arith.constant 1.000000e+00 : f32
    %cst_1 = arith.constant 0.000000e+00 : f32
    %4 = vector.broadcast %cst : f32 to vector<8x128xf32>
    %5 = vector.broadcast %cst_1 : f32 to vector<8x128xf32>
    %6 = arith.select %3, %4, %5 : vector<8x128xi1>, vector<8x128xf32>
    %c0_2 = arith.constant 0 : index
    %c0_3 = arith.constant 0 : index
    %c0_4 = arith.constant 0 : index
    %c0_5 = arith.constant 0 : index
    %7 = vector.load %arg2[%c0_2, %c0_3, %c0_4, %c0_5] : memref<1x1x16x256xf32, #tpu.memory_space<vmem>>, vector<1x1x8x128xf32>
    %8 = vector.shape_cast %7 : vector<1x1x8x128xf32> to vector<8x128xf32>
    %c0_6 = arith.constant 0 : index
    %c0_7 = arith.constant 0 : index
    %c0_8 = arith.constant 0 : index
    %9 = vector.load %arg7[%c0_6, %c0_7, %c0_8] : memref<2x80x128xf32, #tpu.memory_space<vmem>>, vector<1x8x128xf32>
    %10 = vector.shape_cast %9 : vector<1x8x128xf32> to vector<8x128xf32>
    %11 = vector.shape_cast %8 : vector<8x128xf32> to vector<1x8x128xf32>
    tpu.vector_store %arg7[%c0_6, %c0_7, %c0_8], %11 {strides = array<i32>} : memref<2x80x128xf32, #tpu.memory_space<vmem>>, vector<1x8x128xf32>,
    %c0_9 = arith.constant 0 : index
    %c0_10 = arith.constant 0 : index
    %c0_11 = arith.constant 0 : index
    %c1 = arith.constant 1 : index
    %12 = vector.load %arg2[%c0_9, %c0_10, %c0_11, %c1] : memref<1x1x16x256xf32, #tpu.memory_space<vmem>>, vector<1x1x8x128xf32>
    %13 = vector.shape_cast %12 : vector<1x1x8x128xf32> to vector<8x128xf32>
    %c0_12 = arith.constant 0 : index
    %c8 = arith.constant 8 : index
    %c0_13 = arith.constant 0 : index
    %14 = vector.load %arg7[%c0_12, %c8, %c0_13] : memref<2x80x128xf32, #tpu.memory_space<vmem>>, vector<1x8x128xf32>
    %15 = vector.shape_cast %14 : vector<1x8x128xf32> to vector<8x128xf32>
    %16 = vector.shape_cast %13 : vector<8x128xf32> to vector<1x8x128xf32>
    tpu.vector_store %arg7[%c0_12, %c8, %c0_13], %16 {strides = array<i32>} : memref<2x80x128xf32, #tpu.memory_space<vmem>>, vector<1x8x128xf32>,
    %c0_14 = arith.constant 0 : index
    %c0_15 = arith.constant 0 : index
    %c0_16 = arith.constant 0 : index
    %c2 = arith.constant 2 : index
    %17 = vector.load %arg2[%c0_14, %c0_15, %c0_16, %c2] : memref<1x1x16x256xf32, #tpu.memory_space<vmem>>, vector<1x1x8x128xf32>
    %18 = vector.shape_cast %17 : vector<1x1x8x128xf32> to vector<8x128xf32>
    %c0_17 = arith.constant 0 : index
    %c16 = arith.constant 16 : index
    %c0_18 = arith.constant 0 : index
    %19 = vector.load %arg7[%c0_17, %c16, %c0_18] : memref<2x80x128xf32, #tpu.memory_space<vmem>>, vector<1x8x128xf32>
    %20 = vector.shape_cast %19 : vector<1x8x128xf32> to vector<8x128xf32>
    %21 = vector.shape_cast %18 : vector<8x128xf32> to vector<1x8x128xf32>
    tpu.vector_store %arg7[%c0_17, %c16, %c0_18], %21 {strides = array<i32>} : memref<2x80x128xf32, #tpu.memory_space<vmem>>, vector<1x8x128xf32>,
    %c0_19 = arith.constant 0 : index
    %c0_20 = arith.constant 0 : index
    %c0_21 = arith.constant 0 : index
    %c18 = arith.constant 18 : index
    %22 = vector.load %arg2[%c0_19, %c0_20, %c0_21, %c18] : memref<1x1x16x256xf32, #tpu.memory_space<vmem>>, vector<1x1x8x128xf32>
    %23 = vector.shape_cast %22 : vector<1x1x8x128xf32> to vector<8x128xf32>
    %c0_22 = arith.constant 0 : index
    %c24 = arith.constant 24 : index
    %c0_23 = arith.constant 0 : index
    %24 = vector.load %arg7[%c0_22, %c24, %c0_23] : memref<2x80x128xf32, #tpu.memory_space<vmem>>, vector<1x8x128xf32>
    %25 = vector.shape_cast %24 : vector<1x8x128xf32> to vector<8x128xf32>
    %26 = vector.shape_cast %23 : vector<8x128xf32> to vector<1x8x128xf32>
    tpu.vector_store %arg7[%c0_22, %c24, %c0_23], %26 {strides = array<i32>} : memref<2x80x128xf32, #tpu.memory_space<vmem>>, vector<1x8x128xf32>,
    %c0_24 = arith.constant 0 : index
    %c0_25 = arith.constant 0 : index
    %c0_26 = arith.constant 0 : index
    %c19 = arith.constant 19 : index
    %27 = vector.load %arg2[%c0_24, %c0_25, %c0_26, %c19] : memref<1x1x16x256xf32, #tpu.memory_space<vmem>>, vector<1x1x8x128xf32>
    %28 = vector.shape_cast %27 : vector<1x1x8x128xf32> to vector<8x128xf32>
    %c0_27 = arith.constant 0 : index
    %c32 = arith.constant 32 : index
    %c0_28 = arith.constant 0 : index
    %29 = vector.load %arg7[%c0_27, %c32, %c0_28] : memref<2x80x128xf32, #tpu.memory_space<vmem>>, vector<1x8x128xf32>
    %30 = vector.shape_cast %29 : vector<1x8x128xf32> to vector<8x128xf32>
    %31 = vector.shape_cast %28 : vector<8x128xf32> to vector<1x8x128xf32>
    tpu.vector_store %arg7[%c0_27, %c32, %c0_28], %31 {strides = array<i32>} : memref<2x80x128xf32, #tpu.memory_space<vmem>>, vector<1x8x128xf32>,
    %c0_29 = arith.constant 0 : index
    %c0_30 = arith.constant 0 : index
    %c0_31 = arith.constant 0 : index
    %c20 = arith.constant 20 : index
    %32 = vector.load %arg2[%c0_29, %c0_30, %c0_31, %c20] : memref<1x1x16x256xf32, #tpu.memory_space<vmem>>, vector<1x1x8x128xf32>
    %33 = vector.shape_cast %32 : vector<1x1x8x128xf32> to vector<8x128xf32>
    %c0_32 = arith.constant 0 : index
    %c40 = arith.constant 40 : index
    %c0_33 = arith.constant 0 : index
    %34 = vector.load %arg7[%c0_32, %c40, %c0_33] : memref<2x80x128xf32, #tpu.memory_space<vmem>>, vector<1x8x128xf32>
    %35 = vector.shape_cast %34 : vector<1x8x128xf32> to vector<8x128xf32>
    %36 = vector.shape_cast %33 : vector<8x128xf32> to vector<1x8x128xf32>
    tpu.vector_store %arg7[%c0_32, %c40, %c0_33], %36 {strides = array<i32>} : memref<2x80x128xf32, #tpu.memory_space<vmem>>, vector<1x8x128xf32>,
    %c0_34 = arith.constant 0 : index
    %c0_35 = arith.constant 0 : index
    %c0_36 = arith.constant 0 : index
    %c36 = arith.constant 36 : index
    %37 = vector.load %arg2[%c0_34, %c0_35, %c0_36, %c36] : memref<1x1x16x256xf32, #tpu.memory_space<vmem>>, vector<1x1x8x128xf32>
    %38 = vector.shape_cast %37 : vector<1x1x8x128xf32> to vector<8x128xf32>
    %c0_37 = arith.constant 0 : index
    %c48 = arith.constant 48 : index
    %c0_38 = arith.constant 0 : index
    %39 = vector.load %arg7[%c0_37, %c48, %c0_38] : memref<2x80x128xf32, #tpu.memory_space<vmem>>, vector<1x8x128xf32>
    %40 = vector.shape_cast %39 : vector<1x8x128xf32> to vector<8x128xf32>
    %41 = vector.shape_cast %38 : vector<8x128xf32> to vector<1x8x128xf32>
    tpu.vector_store %arg7[%c0_37, %c48, %c0_38], %41 {strides = array<i32>} : memref<2x80x128xf32, #tpu.memory_space<vmem>>, vector<1x8x128xf32>,
    %c0_39 = arith.constant 0 : index
    %c0_40 = arith.constant 0 : index
    %c0_41 = arith.constant 0 : index
    %c37 = arith.constant 37 : index
    %42 = vector.load %arg2[%c0_39, %c0_40, %c0_41, %c37] : memref<1x1x16x256xf32, #tpu.memory_space<vmem>>, vector<1x1x8x128xf32>
    %43 = vector.shape_cast %42 : vector<1x1x8x128xf32> to vector<8x128xf32>
    %c0_42 = arith.constant 0 : index
    %c56 = arith.constant 56 : index
    %c0_43 = arith.constant 0 : index
    %44 = vector.load %arg7[%c0_42, %c56, %c0_43] : memref<2x80x128xf32, #tpu.memory_space<vmem>>, vector<1x8x128xf32>
    %45 = vector.shape_cast %44 : vector<1x8x128xf32> to vector<8x128xf32>
    %46 = vector.shape_cast %43 : vector<8x128xf32> to vector<1x8x128xf32>
    tpu.vector_store %arg7[%c0_42, %c56, %c0_43], %46 {strides = array<i32>} : memref<2x80x128xf32, #tpu.memory_space<vmem>>, vector<1x8x128xf32>,
    %c0_44 = arith.constant 0 : index
    %c0_45 = arith.constant 0 : index
    %c0_46 = arith.constant 0 : index
    %c38 = arith.constant 38 : index
    %47 = vector.load %arg2[%c0_44, %c0_45, %c0_46, %c38] : memref<1x1x16x256xf32, #tpu.memory_space<vmem>>, vector<1x1x8x128xf32>
    %48 = vector.shape_cast %47 : vector<1x1x8x128xf32> to vector<8x128xf32>
    %c0_47 = arith.constant 0 : index
    %c64 = arith.constant 64 : index
    %c0_48 = arith.constant 0 : index
    %49 = vector.load %arg7[%c0_47, %c64, %c0_48] : memref<2x80x128xf32, #tpu.memory_space<vmem>>, vector<1x8x128xf32>
    %50 = vector.shape_cast %49 : vector<1x8x128xf32> to vector<8x128xf32>
    %51 = vector.shape_cast %48 : vector<8x128xf32> to vector<1x8x128xf32>
    tpu.vector_store %arg7[%c0_47, %c64, %c0_48], %51 {strides = array<i32>} : memref<2x80x128xf32, #tpu.memory_space<vmem>>, vector<1x8x128xf32>,
    %c0_49 = arith.constant 0 : index
    %c72 = arith.constant 72 : index
    %c0_50 = arith.constant 0 : index
    %52 = vector.load %arg7[%c0_49, %c72, %c0_50] : memref<2x80x128xf32, #tpu.memory_space<vmem>>, vector<1x8x128xf32>
    %53 = vector.shape_cast %52 : vector<1x8x128xf32> to vector<8x128xf32>
    %54 = vector.shape_cast %6 : vector<8x128xf32> to vector<1x8x128xf32>
    tpu.vector_store %arg7[%c0_49, %c72, %c0_50], %54 {strides = array<i32>} : memref<2x80x128xf32, #tpu.memory_space<vmem>>, vector<1x8x128xf32>,
    %c0_51 = arith.constant 0 : index
    %c0_52 = arith.constant 0 : index
    %c0_53 = arith.constant 0 : index
    %55 = vector.load %arg7[%c0_51, %c0_52, %c0_53] : memref<2x80x128xf32, #tpu.memory_space<vmem>>, vector<1x80x128xf32>
    %56 = vector.shape_cast %55 : vector<1x80x128xf32> to vector<80x128xf32>
    %cst_54 = arith.constant dense<0.000000e+00> : vector<16x128xf32>
    %57 = tpu.matmul %0, %56, %cst_54 {dimension_numbers = #tpu.dot_dimension_numbers<[1], [0], [0], [1], [0, 0, 1, 1], [], []>} : vector<16x80xf32>, vector<80x128xf32>, vector<16x128xf32> -> vector<16x128xf32>
    %c0_55 = arith.constant 0 : index
    %c0_56 = arith.constant 0 : index
    %c8_57 = arith.constant 8 : index
    %c0_58 = arith.constant 0 : index
    %58 = vector.load %arg2[%c0_55, %c0_56, %c8_57, %c0_58] : memref<1x1x16x256xf32, #tpu.memory_space<vmem>>, vector<1x1x8x128xf32>
    %59 = vector.shape_cast %58 : vector<1x1x8x128xf32> to vector<8x128xf32>
    %c1_59 = arith.constant 1 : index
    %c0_60 = arith.constant 0 : index
    %c0_61 = arith.constant 0 : index
    %60 = vector.load %arg7[%c1_59, %c0_60, %c0_61] : memref<2x80x128xf32, #tpu.memory_space<vmem>>, vector<1x8x128xf32>
    %61 = vector.shape_cast %60 : vector<1x8x128xf32> to vector<8x128xf32>
    %62 = vector.shape_cast %59 : vector<8x128xf32> to vector<1x8x128xf32>
    tpu.vector_store %arg7[%c1_59, %c0_60, %c0_61], %62 {strides = array<i32>} : memref<2x80x128xf32, #tpu.memory_space<vmem>>, vector<1x8x128xf32>,
    %c0_62 = arith.constant 0 : index
    %c0_63 = arith.constant 0 : index
    %c8_64 = arith.constant 8 : index
    %c1_65 = arith.constant 1 : index
    %63 = vector.load %arg2[%c0_62, %c0_63, %c8_64, %c1_65] : memref<1x1x16x256xf32, #tpu.memory_space<vmem>>, vector<1x1x8x128xf32>
    %64 = vector.shape_cast %63 : vector<1x1x8x128xf32> to vector<8x128xf32>
    %c1_66 = arith.constant 1 : index
    %c8_67 = arith.constant 8 : index
    %c0_68 = arith.constant 0 : index
    %65 = vector.load %arg7[%c1_66, %c8_67, %c0_68] : memref<2x80x128xf32, #tpu.memory_space<vmem>>, vector<1x8x128xf32>
    %66 = vector.shape_cast %65 : vector<1x8x128xf32> to vector<8x128xf32>
    %67 = vector.shape_cast %64 : vector<8x128xf32> to vector<1x8x128xf32>
    tpu.vector_store %arg7[%c1_66, %c8_67, %c0_68], %67 {strides = array<i32>} : memref<2x80x128xf32, #tpu.memory_space<vmem>>, vector<1x8x128xf32>,
    %c0_69 = arith.constant 0 : index
    %c0_70 = arith.constant 0 : index
    %c8_71 = arith.constant 8 : index
    %c2_72 = arith.constant 2 : index
    %68 = vector.load %arg2[%c0_69, %c0_70, %c8_71, %c2_72] : memref<1x1x16x256xf32, #tpu.memory_space<vmem>>, vector<1x1x8x128xf32>
    %69 = vector.shape_cast %68 : vector<1x1x8x128xf32> to vector<8x128xf32>
    %c1_73 = arith.constant 1 : index
    %c16_74 = arith.constant 16 : index
    %c0_75 = arith.constant 0 : index
    %70 = vector.load %arg7[%c1_73, %c16_74, %c0_75] : memref<2x80x128xf32, #tpu.memory_space<vmem>>, vector<1x8x128xf32>
    %71 = vector.shape_cast %70 : vector<1x8x128xf32> to vector<8x128xf32>
    %72 = vector.shape_cast %69 : vector<8x128xf32> to vector<1x8x128xf32>
    tpu.vector_store %arg7[%c1_73, %c16_74, %c0_75], %72 {strides = array<i32>} : memref<2x80x128xf32, #tpu.memory_space<vmem>>, vector<1x8x128xf32>,
    %c0_76 = arith.constant 0 : index
    %c0_77 = arith.constant 0 : index
    %c8_78 = arith.constant 8 : index
    %c18_79 = arith.constant 18 : index
    %73 = vector.load %arg2[%c0_76, %c0_77, %c8_78, %c18_79] : memref<1x1x16x256xf32, #tpu.memory_space<vmem>>, vector<1x1x8x128xf32>
    %74 = vector.shape_cast %73 : vector<1x1x8x128xf32> to vector<8x128xf32>
    %c1_80 = arith.constant 1 : index
    %c24_81 = arith.constant 24 : index
    %c0_82 = arith.constant 0 : index
    %75 = vector.load %arg7[%c1_80, %c24_81, %c0_82] : memref<2x80x128xf32, #tpu.memory_space<vmem>>, vector<1x8x128xf32>
    %76 = vector.shape_cast %75 : vector<1x8x128xf32> to vector<8x128xf32>
    %77 = vector.shape_cast %74 : vector<8x128xf32> to vector<1x8x128xf32>
    tpu.vector_store %arg7[%c1_80, %c24_81, %c0_82], %77 {strides = array<i32>} : memref<2x80x128xf32, #tpu.memory_space<vmem>>, vector<1x8x128xf32>,
    %c0_83 = arith.constant 0 : index
    %c0_84 = arith.constant 0 : index
    %c8_85 = arith.constant 8 : index
    %c19_86 = arith.constant 19 : index
    %78 = vector.load %arg2[%c0_83, %c0_84, %c8_85, %c19_86] : memref<1x1x16x256xf32, #tpu.memory_space<vmem>>, vector<1x1x8x128xf32>
    %79 = vector.shape_cast %78 : vector<1x1x8x128xf32> to vector<8x128xf32>
    %c1_87 = arith.constant 1 : index
    %c32_88 = arith.constant 32 : index
    %c0_89 = arith.constant 0 : index
    %80 = vector.load %arg7[%c1_87, %c32_88, %c0_89] : memref<2x80x128xf32, #tpu.memory_space<vmem>>, vector<1x8x128xf32>
    %81 = vector.shape_cast %80 : vector<1x8x128xf32> to vector<8x128xf32>
    %82 = vector.shape_cast %79 : vector<8x128xf32> to vector<1x8x128xf32>
    tpu.vector_store %arg7[%c1_87, %c32_88, %c0_89], %82 {strides = array<i32>} : memref<2x80x128xf32, #tpu.memory_space<vmem>>, vector<1x8x128xf32>,
    %c0_90 = arith.constant 0 : index
    %c0_91 = arith.constant 0 : index
    %c8_92 = arith.constant 8 : index
    %c20_93 = arith.constant 20 : index
    %83 = vector.load %arg2[%c0_90, %c0_91, %c8_92, %c20_93] : memref<1x1x16x256xf32, #tpu.memory_space<vmem>>, vector<1x1x8x128xf32>
    %84 = vector.shape_cast %83 : vector<1x1x8x128xf32> to vector<8x128xf32>
    %c1_94 = arith.constant 1 : index
    %c40_95 = arith.constant 40 : index
    %c0_96 = arith.constant 0 : index
    %85 = vector.load %arg7[%c1_94, %c40_95, %c0_96] : memref<2x80x128xf32, #tpu.memory_space<vmem>>, vector<1x8x128xf32>
    %86 = vector.shape_cast %85 : vector<1x8x128xf32> to vector<8x128xf32>
    %87 = vector.shape_cast %84 : vector<8x128xf32> to vector<1x8x128xf32>
    tpu.vector_store %arg7[%c1_94, %c40_95, %c0_96], %87 {strides = array<i32>} : memref<2x80x128xf32, #tpu.memory_space<vmem>>, vector<1x8x128xf32>,
    %c0_97 = arith.constant 0 : index
    %c0_98 = arith.constant 0 : index
    %c8_99 = arith.constant 8 : index
    %c36_100 = arith.constant 36 : index
    %88 = vector.load %arg2[%c0_97, %c0_98, %c8_99, %c36_100] : memref<1x1x16x256xf32, #tpu.memory_space<vmem>>, vector<1x1x8x128xf32>
    %89 = vector.shape_cast %88 : vector<1x1x8x128xf32> to vector<8x128xf32>
    %c1_101 = arith.constant 1 : index
    %c48_102 = arith.constant 48 : index
    %c0_103 = arith.constant 0 : index
    %90 = vector.load %arg7[%c1_101, %c48_102, %c0_103] : memref<2x80x128xf32, #tpu.memory_space<vmem>>, vector<1x8x128xf32>
    %91 = vector.shape_cast %90 : vector<1x8x128xf32> to vector<8x128xf32>
    %92 = vector.shape_cast %89 : vector<8x128xf32> to vector<1x8x128xf32>
    tpu.vector_store %arg7[%c1_101, %c48_102, %c0_103], %92 {strides = array<i32>} : memref<2x80x128xf32, #tpu.memory_space<vmem>>, vector<1x8x128xf32>,
    %c0_104 = arith.constant 0 : index
    %c0_105 = arith.constant 0 : index
    %c8_106 = arith.constant 8 : index
    %c37_107 = arith.constant 37 : index
    %93 = vector.load %arg2[%c0_104, %c0_105, %c8_106, %c37_107] : memref<1x1x16x256xf32, #tpu.memory_space<vmem>>, vector<1x1x8x128xf32>
    %94 = vector.shape_cast %93 : vector<1x1x8x128xf32> to vector<8x128xf32>
    %c1_108 = arith.constant 1 : index
    %c56_109 = arith.constant 56 : index
    %c0_110 = arith.constant 0 : index
    %95 = vector.load %arg7[%c1_108, %c56_109, %c0_110] : memref<2x80x128xf32, #tpu.memory_space<vmem>>, vector<1x8x128xf32>
    %96 = vector.shape_cast %95 : vector<1x8x128xf32> to vector<8x128xf32>
    %97 = vector.shape_cast %94 : vector<8x128xf32> to vector<1x8x128xf32>
    tpu.vector_store %arg7[%c1_108, %c56_109, %c0_110], %97 {strides = array<i32>} : memref<2x80x128xf32, #tpu.memory_space<vmem>>, vector<1x8x128xf32>,
    %c0_111 = arith.constant 0 : index
    %c0_112 = arith.constant 0 : index
    %c8_113 = arith.constant 8 : index
    %c38_114 = arith.constant 38 : index
    %98 = vector.load %arg2[%c0_111, %c0_112, %c8_113, %c38_114] : memref<1x1x16x256xf32, #tpu.memory_space<vmem>>, vector<1x1x8x128xf32>
    %99 = vector.shape_cast %98 : vector<1x1x8x128xf32> to vector<8x128xf32>
    %c1_115 = arith.constant 1 : index
    %c64_116 = arith.constant 64 : index
    %c0_117 = arith.constant 0 : index
    %100 = vector.load %arg7[%c1_115, %c64_116, %c0_117] : memref<2x80x128xf32, #tpu.memory_space<vmem>>, vector<1x8x128xf32>
    %101 = vector.shape_cast %100 : vector<1x8x128xf32> to vector<8x128xf32>
    %102 = vector.shape_cast %99 : vector<8x128xf32> to vector<1x8x128xf32>
    tpu.vector_store %arg7[%c1_115, %c64_116, %c0_117], %102 {strides = array<i32>} : memref<2x80x128xf32, #tpu.memory_space<vmem>>, vector<1x8x128xf32>,
    %c1_118 = arith.constant 1 : index
    %c72_119 = arith.constant 72 : index
    %c0_120 = arith.constant 0 : index
    %103 = vector.load %arg7[%c1_118, %c72_119, %c0_120] : memref<2x80x128xf32, #tpu.memory_space<vmem>>, vector<1x8x128xf32>
    %104 = vector.shape_cast %103 : vector<1x8x128xf32> to vector<8x128xf32>
    %105 = vector.shape_cast %6 : vector<8x128xf32> to vector<1x8x128xf32>
    tpu.vector_store %arg7[%c1_118, %c72_119, %c0_120], %105 {strides = array<i32>} : memref<2x80x128xf32, #tpu.memory_space<vmem>>, vector<1x8x128xf32>,
    %c1_121 = arith.constant 1 : index
    %c0_122 = arith.constant 0 : index
    %c0_123 = arith.constant 0 : index
    %106 = vector.load %arg7[%c1_121, %c0_122, %c0_123] : memref<2x80x128xf32, #tpu.memory_space<vmem>>, vector<1x80x128xf32>
    %107 = vector.shape_cast %106 : vector<1x80x128xf32> to vector<80x128xf32>
    %cst_124 = arith.constant dense<0.000000e+00> : vector<16x128xf32>
    %108 = tpu.matmul %0, %107, %cst_124 {dimension_numbers = #tpu.dot_dimension_numbers<[1], [0], [0], [1], [0, 0, 1, 1], [], []>} : vector<16x80xf32>, vector<80x128xf32>, vector<16x128xf32> -> vector<16x128xf32>
    %109 = vector.extract_strided_slice %57 {offsets = [0, 0], sizes = [4, 128], strides = [1, 1]} : vector<16x128xf32> to vector<4x128xf32>
    %110 = vector.extract_strided_slice %108 {offsets = [0, 0], sizes = [4, 128], strides = [1, 1]} : vector<16x128xf32> to vector<4x128xf32>
    %111 = vector.extract_strided_slice %57 {offsets = [4, 0], sizes = [4, 128], strides = [1, 1]} : vector<16x128xf32> to vector<4x128xf32>
    %112 = vector.extract_strided_slice %108 {offsets = [4, 0], sizes = [4, 128], strides = [1, 1]} : vector<16x128xf32> to vector<4x128xf32>
    %113 = vector.extract_strided_slice %57 {offsets = [8, 0], sizes = [4, 128], strides = [1, 1]} : vector<16x128xf32> to vector<4x128xf32>
    %114 = vector.extract_strided_slice %108 {offsets = [8, 0], sizes = [4, 128], strides = [1, 1]} : vector<16x128xf32> to vector<4x128xf32>
    %115 = vector.extract_strided_slice %57 {offsets = [12, 0], sizes = [4, 128], strides = [1, 1]} : vector<16x128xf32> to vector<4x128xf32>
    %116 = vector.extract_strided_slice %108 {offsets = [12, 0], sizes = [4, 128], strides = [1, 1]} : vector<16x128xf32> to vector<4x128xf32>
    %117 = tpu.concatenate %109, %110, %111, %112, %113, %114, %115, %116 in 0 : vector<4x128xf32>, vector<4x128xf32>, vector<4x128xf32>, vector<4x128xf32>, vector<4x128xf32>, vector<4x128xf32>, vector<4x128xf32>, vector<4x128xf32> -> vector<32x128xf32>
    %118 = vector.extract_strided_slice %117 {offsets = [0, 0], sizes = [24, 128], strides = [1, 1]} : vector<32x128xf32> to vector<24x128xf32>
    %cst_125 = arith.constant 5.000000e-01 : f32
    %119 = vector.broadcast %cst_125 : f32 to vector<24x128xf32>
    %120 = arith.mulf %118, %119 : vector<24x128xf32>
    %121 = math.tanh %120 : vector<24x128xf32>
    %cst_126 = arith.constant 5.000000e-01 : f32
    %122 = vector.broadcast %cst_126 : f32 to vector<24x128xf32>
    %123 = arith.mulf %121, %122 : vector<24x128xf32>
    %cst_127 = arith.constant 5.000000e-01 : f32
    %124 = vector.broadcast %cst_127 : f32 to vector<24x128xf32>
    %125 = arith.addf %123, %124 : vector<24x128xf32>
    %126 = vector.extract_strided_slice %117 {offsets = [24, 0], sizes = [8, 128], strides = [1, 1]} : vector<32x128xf32> to vector<8x128xf32>
    %127 = math.tanh %126 : vector<8x128xf32>
    %128 = vector.extract_strided_slice %125 {offsets = [0, 0], sizes = [8, 128], strides = [1, 1]} : vector<24x128xf32> to vector<8x128xf32>
    %129 = vector.extract_strided_slice %125 {offsets = [8, 0], sizes = [8, 128], strides = [1, 1]} : vector<24x128xf32> to vector<8x128xf32>
    %130 = vector.extract_strided_slice %125 {offsets = [16, 0], sizes = [8, 128], strides = [1, 1]} : vector<24x128xf32> to vector<8x128xf32>
    %c0_128 = arith.constant 0 : index
    %c0_129 = arith.constant 0 : index
    %c0_130 = arith.constant 0 : index
    %131 = vector.load %arg4[%c0_128, %c0_129, %c0_130] : memref<1x8x128xf32, #tpu.memory_space<vmem>>, vector<1x8x128xf32>
    %132 = vector.shape_cast %131 : vector<1x8x128xf32> to vector<8x128xf32>
    %133 = arith.mulf %129, %132 : vector<8x128xf32>
    %134 = arith.mulf %128, %127 : vector<8x128xf32>
    %135 = arith.addf %133, %134 : vector<8x128xf32>
    %136 = math.tanh %135 : vector<8x128xf32>
    %137 = arith.mulf %130, %136 : vector<8x128xf32>
    %c0_131 = arith.constant 0 : index
    %c0_132 = arith.constant 0 : index
    %c0_133 = arith.constant 0 : index
    %138 = vector.load %arg6[%c0_131, %c0_132, %c0_133] : memref<1x8x128xf32, #tpu.memory_space<vmem>>, vector<1x8x128xf32>
    %139 = vector.shape_cast %138 : vector<1x8x128xf32> to vector<8x128xf32>
    %140 = vector.shape_cast %135 : vector<8x128xf32> to vector<1x8x128xf32>
    tpu.vector_store %arg6[%c0_131, %c0_132, %c0_133], %140 {strides = array<i32>} : memref<1x8x128xf32, #tpu.memory_space<vmem>>, vector<1x8x128xf32>,
    %c0_134 = arith.constant 0 : index
    %c0_135 = arith.constant 0 : index
    %c0_136 = arith.constant 0 : index
    %141 = vector.load %arg5[%c0_134, %c0_135, %c0_136] : memref<1x8x128xf32, #tpu.memory_space<vmem>>, vector<1x8x128xf32>
    %142 = vector.shape_cast %141 : vector<1x8x128xf32> to vector<8x128xf32>
    %143 = vector.shape_cast %137 : vector<8x128xf32> to vector<1x8x128xf32>
    tpu.vector_store %arg5[%c0_134, %c0_135, %c0_136], %143 {strides = array<i32>} : memref<1x8x128xf32, #tpu.memory_space<vmem>>, vector<1x8x128xf32>,
    return
  }
  func.func @transform_0(%arg0: i32, %arg1: i32) -> (i32, i32, i32, i32) {
    %c0_i32 = arith.constant 0 : i32
    %c0_i32_0 = arith.constant 0 : i32
    %c0_i32_1 = arith.constant 0 : i32
    return %arg0, %arg1, %c0_i32, %c0_i32_0 : i32, i32, i32, i32
  }
  func.func @transform_1(%arg0: i32, %arg1: i32) -> (i32, i32) {
    %c0_i32 = arith.constant 0 : i32
    %c0_i32_0 = arith.constant 0 : i32
    %c0_i32_1 = arith.constant 0 : i32
    return %c0_i32, %c0_i32_0 : i32, i32
  }
  func.func @transform_2(%arg0: i32, %arg1: i32) -> (i32, i32, i32) {
    %c0_i32 = arith.constant 0 : i32
    %c0_i32_0 = arith.constant 0 : i32
    return %arg0, %c0_i32, %arg1 : i32, i32, i32
  }
  func.func @transform_3(%arg0: i32, %arg1: i32) -> (i32, i32, i32) {
    %c0_i32 = arith.constant 0 : i32
    %c0_i32_0 = arith.constant 0 : i32
    return %arg0, %c0_i32, %arg1 : i32, i32, i32
  }
  func.func @transform_4(%arg0: i32, %arg1: i32) -> (i32, i32, i32) {
    %c0_i32 = arith.constant 0 : i32
    %c0_i32_0 = arith.constant 0 : i32
    return %arg0, %c0_i32, %arg1 : i32, i32, i32
  }
}

</mosaic_0001>

<bundles_post_ra>
// kernel: conv_lstm_pallas.1
= control target key start
LH: loop header
LB: loop body
LE: loop exit
PB: predicated region body
PF: predicated region fallthrough
CT: control target
= control target key end

     0   :  { %s1163_s15 = smov 0   ;;  %s1165_s16 = smov 0   ;;  %s1230_s0 = inlined_call_operand.vmem [shape: f32[1,3,16,256], index: 0, kind: input, shape index: {}]   ;;  %s1231_s1 = inlined_call_operand.vmem [shape: f32[16,80], index: 1, kind: input, shape index: {}]   ;;  %s1232_s2 = inlined_call_operand.vmem [shape: f32[1,8,384], index: 2, kind: input, shape index: {}]   ;;  %s1233_s3 = inlined_call_operand.vmem [shape: f32[1,8,384], index: 3, kind: output, shape index: {0}]   ;;  %s1234_s4 = inlined_call_operand.vmem [shape: f32[1,8,384], index: 4, kind: output, shape index: {1}]  }
   0x1   :  { %s1167_s17 = smov 0  }
   0x2 LB: > { %s24_s18 = sadd.s32 1, %s1122_s16  ;;  %p851_p0 = scmp.ge.s32.totalorder %s1126_s17, 1  ;;  %s1126_s17 = sphi %s1167_s17, %s15_s17   ;;  %s1122_s16 = sphi %s1165_s16, %s1236_s16   ;;  %s1118_s15 = sphi %s1163_s15, %s1235_s15  }
   0x3   : > { %p25_p1 = scmp.ge.s32.totalorder %s24_s18, 3  ;;  %p202_p2 = scmp.lt.s32.totalorder %s1126_s17, 4 }
   0x5   : > { %s1238_s18 = smov (%p25_p1, %s24_s18), 0  ;;  %p203_p3 = pnand %p851_p0, %p202_p2 }
   0x6   : > { %p253_p4 = scmp.lt.s32.totalorder (!%p203_p3), %s1118_s15, 2  ;;  %s1128_s23 = smov (!%p203_p3), 126   ;;  %v284_v6 = vld [vmem:[%s1231_s1] sm:$0xff] (!%p203_p3)  ;;  %vm399_vm0 = vcmask (!%p203_p3), 654336   ;;  %vm300_vm1 = vcmask (!%p203_p3), 1039360   ;;  %vm312_vm2 = vcmask (!%p203_p3), 1031168   ;;  %v286_v55 = vlaneseq (!%p203_p3) }
   0x7   : > { %206 = sbr.rel (%p203_p3) target bundleno = 424 (0x1a8), region = 32  ;;  %s1129_s24 = smov (!%p203_p3), 127   ;;  %910 = vmatprep.mubr.msk.f32.mxu0 (!%p203_p3), %vm399_vm0, %v284_v6  ;;  %933 = vmatprep.mubr.msk.f32.mxu1 (!%p203_p3), %vm399_vm0, %v284_v6  ;;  %vm324_vm3 = vcmask (!%p203_p3), 900096   ;;  %vm336_vm4 = vcmask (!%p203_p3), 891904   ;;  %vm348_vm5 = vcmask (!%p203_p3), 883712   ;;  %vm360_vm6 = vcmask (!%p203_p3), 752640  }
   0x8   : > { %s1130_s25 = smov (!%p203_p3), 110   ;;  %s1131_s26 = smov (!%p203_p3), 108   ;;  %vm372_vm7 = vcmask (!%p203_p3), 744448   ;;  %vm384_vm8 = vcmask (!%p203_p3), 736256   ;;  %vm1136_vm10 = vmmov (!%p203_p3), 1   ;;  %vm670_vm12 = vcmask (!%p203_p3), 1043456  }
   0x9   : > { %s1132_s27 = smov (!%p203_p3), 109   ;;  %s1133_s28 = smov (!%p203_p3), 91  }
   0xa   : > { %s1134_s29 = smov (!%p203_p3), 92   ;;  %s1135_s6 = smov (!%p203_p3), 90  }
   0xe   : > { %s1240_s15 = smov (!%p253_p4, %s1118_s15), 2 }
   0xf   : > { %s863_s19 = sshll.u32 %s1240_s15, 5  ;;  %s854_s9 = sshll.u32 %s1240_s15, 3 }
  0x10   : > { %s259_s22 = scalar_lea.vmem %s1230_s0, %s863_s19  ;;  %s267_s12 = scalar_lea.vmem %s1232_s2, %s854_s9 }
  0x11   : > { %v304_v0 = vld [vmem:[%s259_s22] sm:$0xff]  ;;  %v305_v1 = vld [vmem:[%s259_s22 + $0x8] sm:$0xff]  ;;  %v484_v2 = vld [vmem:[%s259_s22 + $0x10] sm:$0xff]  ;;  %s283_s15 = scalar_lea.vmem %s1234_s4, %s854_s9  ;;  %s275_s21 = scalar_lea.vmem %s1233_s3, %s854_s9 }
  0x12   : > { %v1024_v3 = vpack.i.bf16 %v305_v1, %v304_v0  ;;  %v485_v4 = vld [vmem:[%s259_s22 + $0x18] sm:$0xff]  ;;  %v287_v1 = vshrl.u32 %v286_v55, 7 }
  0x13   : > { %v1019_v5 = vpack.i.bf16 %v485_v4, %v484_v2 }
  0x14   : > { %1025 = vrot.lane.b32.xlu1 %v1024_v3, %s1128_s23  ;;  %1015 = vrot.lane.b32.xlu0 %v1024_v3, %s1129_s24  ;;  %vm288_vm9 = vcmp.eq.s32.totalorder %v287_v1, 0 }
  0x15   : > { %vm953_vm11 = vmpackc.low %vm288_vm9, %vm1136_vm10 }
  0x18   : > { %1030 = vrot.lane.b32.xlu1 %v1024_v3, %s1130_s25  ;;  %1020 = vrot.lane.b32.xlu0 %v1019_v5, %s1129_s24 }
  0x1c   : > { %1040 = vrot.lane.b32.xlu1 %v1019_v5, %s1130_s25  ;;  %1035 = vrot.lane.b32.xlu0 %v1019_v5, %s1128_s23 }
  0x20   : > { %1050 = vrot.lane.b32.xlu1 %v1024_v3, %s1131_s26  ;;  %1045 = vrot.lane.b32.xlu0 %v1024_v3, %s1132_s27 }
  0x24   : > { %1060 = vrot.lane.b32.xlu1 %v1019_v5, %s1131_s26  ;;  %1055 = vrot.lane.b32.xlu0 %v1019_v5, %s1132_s27 }
  0x28   : > { %1070 = vrot.lane.b32.xlu1 %v1024_v3, %s1133_s28  ;;  %1065 = vrot.lane.b32.xlu0 %v1024_v3, %s1134_s29 }
  0x2c   : > { %1080 = vrot.lane.b32.xlu1 %v1019_v5, %s1133_s28  ;;  %1075 = vrot.lane.b32.xlu0 %v1019_v5, %s1134_s29 }
  0x30   : > { %1090 = vrot.lane.b32.xlu1 %v1019_v5, %s1135_s6  ;;  %1085 = vrot.lane.b32.xlu0 %v1024_v3, %s1135_s6 }
  0x86   : > { %v1026_v7 = vpop.permute.xlu1 %1025  ;;  %v1016_v8 = vpop.permute.xlu0 %1015 }
  0x87   : > { %v1018_v9 = vunpack.i.h.bf16 %v1016_v8  ;;  %v1017_v10 = vunpack.i.l.bf16 %v1016_v8  ;;  %v1028_v11 = vunpack.i.h.bf16 %v1026_v7  ;;  %v1027_v12 = vunpack.i.l.bf16 %v1026_v7 }
  0x89   : > { %v301_v13 = vsel %vm300_vm1, %v1017_v10, %v1018_v9  ;;  %v313_v21 = vsel %vm312_vm2, %v1027_v12, %v1028_v11 }
  0x8a   : > { %v1031_v14 = vpop.permute.xlu1 %1030  ;;  %v1021_v15 = vpop.permute.xlu0 %1020  ;;  %v936_v16 = vpack.c.bf16 %v301_v13, %v304_v0 }
  0x8b   : > { %v1033_v17 = vunpack.i.h.bf16 %v1031_v14  ;;  %v1032_v18 = vunpack.i.l.bf16 %v1031_v14  ;;  %v1023_v19 = vunpack.i.h.bf16 %v1021_v15  ;;  %v1022_v20 = vunpack.i.l.bf16 %v1021_v15 }
  0x8c   : > { %937 = vmatprep.subr.bf16.mxu0 %v936_v16 }
  0x8d   : > { %939 = vmatpush3.bf16.msra.mxu0 %v936_v16  ;;  %v325_v22 = vsel %vm324_vm3, %v1032_v18, %v1033_v17  ;;  %v492_v23 = vsel %vm300_vm1, %v1022_v20, %v1023_v19  ;;  %v1137_v17 = vmov 1.0   ;;  %v285_v20 = vld [vmem:[%s1231_s1 + $0x8] sm:$0xff] }
  0x8e   : > { %v1041_v24 = vpop.permute.xlu1 %1040  ;;  %v1036_v25 = vpop.permute.xlu0 %1035  ;;  %v940_v26 = vpack.c.bf16 %v325_v22, %v313_v21  ;;  %v958_v27 = vpack.c.bf16 %v492_v23, %v484_v2 }
  0x8f   : > { %v1043_v28 = vunpack.i.h.bf16 %v1041_v24  ;;  %v1042_v29 = vunpack.i.l.bf16 %v1041_v24  ;;  %v1038_v30 = vunpack.i.h.bf16 %v1036_v25  ;;  %v1037_v31 = vunpack.i.l.bf16 %v1036_v25 }
  0x90   : > { %941 = vmatprep.subr.bf16.mxu0 %v940_v26  ;;  %959 = vmatprep.subr.bf16.mxu1 %v958_v27 }
  0x91   : > { %943 = vmatpush3.bf16.msra.mxu0 %v940_v26  ;;  %961 = vmatpush3.bf16.msra.mxu1 %v958_v27  ;;  %v503_v32 = vsel %vm312_vm2, %v1037_v31, %v1038_v30  ;;  %v514_v33 = vsel %vm324_vm3, %v1042_v29, %v1043_v28 }
  0x92   : > { %v1051_v34 = vpop.permute.xlu1 %1050  ;;  %v1046_v35 = vpop.permute.xlu0 %1045  ;;  %v962_v36 = vpack.c.bf16 %v514_v33, %v503_v32 }
  0x93   : > { %v1053_v37 = vunpack.i.h.bf16 %v1051_v34  ;;  %v1052_v38 = vunpack.i.l.bf16 %v1051_v34  ;;  %v1048_v39 = vunpack.i.h.bf16 %v1046_v35  ;;  %v1047_v40 = vunpack.i.l.bf16 %v1046_v35 }
  0x94   : > { %963 = vmatprep.subr.bf16.mxu1 %v962_v36 }
  0x95   : > { %965 = vmatpush3.bf16.msra.mxu1 %v962_v36  ;;  %v337_v41 = vsel %vm336_vm4, %v1047_v40, %v1048_v39  ;;  %v349_v42 = vsel %vm348_vm5, %v1052_v38, %v1053_v37 }
  0x96   : > { %v1061_v43 = vpop.permute.xlu1 %1060  ;;  %v1056_v44 = vpop.permute.xlu0 %1055  ;;  %v944_v45 = vpack.c.bf16 %v349_v42, %v337_v41  ;;  %v688_v41 = vld [vmem:[%s267_s12] sm:$0xff] }
  0x97   : > { %v1063_v46 = vunpack.i.h.bf16 %v1061_v43  ;;  %v1062_v47 = vunpack.i.l.bf16 %v1061_v43  ;;  %v1058_v48 = vunpack.i.h.bf16 %v1056_v44  ;;  %v1057_v49 = vunpack.i.l.bf16 %v1056_v44 }
  0x98   : > { %945 = vmatprep.subr.bf16.mxu0 %v944_v45 }
  0x99   : > { %947 = vmatpush3.bf16.msra.mxu0 %v944_v45  ;;  %v525_v50 = vsel %vm336_vm4, %v1057_v49, %v1058_v48  ;;  %v536_v51 = vsel %vm348_vm5, %v1062_v47, %v1063_v46 }
  0x9a   : > { %v1071_v52 = vpop.permute.xlu1 %1070  ;;  %v1066_v53 = vpop.permute.xlu0 %1065  ;;  %v966_v54 = vpack.c.bf16 %v536_v51, %v525_v50 }
  0x9b   : > { %v1073_v56 = vunpack.i.h.bf16 %v1071_v52  ;;  %v1072_v57 = vunpack.i.l.bf16 %v1071_v52  ;;  %v1068_v58 = vunpack.i.h.bf16 %v1066_v53  ;;  %v1067_v59 = vunpack.i.l.bf16 %v1066_v53 }
  0x9c   : > { %967 = vmatprep.subr.bf16.mxu1 %v966_v54 }
  0x9d   : > { %969 = vmatpush3.bf16.msra.mxu1 %v966_v54  ;;  %v361_v60 = vsel %vm360_vm6, %v1067_v59, %v1068_v58  ;;  %v373_v61 = vsel %vm372_vm7, %v1072_v57, %v1073_v56 }
  0x9e   : > { %v1081_v62 = vpop.permute.xlu1 %1080  ;;  %v1076_v63 = vpop.permute.xlu0 %1075  ;;  %v948_v0 = vpack.c.bf16 %v373_v61, %v361_v60 }
  0x9f   : > { %v1083_v2 = vunpack.i.h.bf16 %v1081_v62  ;;  %v1082_v3 = vunpack.i.l.bf16 %v1081_v62  ;;  %v1078_v4 = vunpack.i.h.bf16 %v1076_v63  ;;  %v1077_v5 = vunpack.i.l.bf16 %v1076_v63 }
  0xa0   : > { %949 = vmatprep.subr.bf16.mxu0 %v948_v0 }
  0xa1   : > { %951 = vmatpush3.bf16.msra.mxu0 %v948_v0  ;;  %v547_v6 = vsel %vm360_vm6, %v1077_v5, %v1078_v4  ;;  %v558_v7 = vsel %vm372_vm7, %v1082_v3, %v1083_v2 }
  0xa2   : > { %v1091_v8 = vpop.permute.xlu1 %1090  ;;  %v1086_v9 = vpop.permute.xlu0 %1085  ;;  %v970_v10 = vpack.c.bf16 %v558_v7, %v547_v6 }
  0xa3   : > { %v1093_v11 = vunpack.i.h.bf16 %v1091_v8  ;;  %v1092_v12 = vunpack.i.l.bf16 %v1091_v8  ;;  %v1088_v13 = vunpack.i.h.bf16 %v1086_v9  ;;  %v1087_v14 = vunpack.i.l.bf16 %v1086_v9 }
  0xa4   : > { %971 = vmatprep.subr.bf16.mxu1 %v970_v10 }
  0xa5   : > { %v569_v15 = vsel %vm384_vm8, %v1092_v12, %v1093_v11  ;;  %v385_v16 = vsel %vm384_vm8, %v1087_v14, %v1088_v13  ;;  %973 = vmatpush3.bf16.msra.mxu1 %v970_v10 }
  0xa6   : > { %v974_v18 = vpack.c.bf16 %v1137_v17, %v569_v15  ;;  %v952_v19 = vpack.c.bf16 %v1137_v17, %v385_v16 }
  0xa8   : > { %954 = vmatprep.subr.msk.bf16.mxu0 %vm953_vm11, %v952_v19  ;;  %976 = vmatprep.subr.msk.bf16.mxu1 %vm953_vm11, %v974_v18 }
  0xa9   : > { %957 = vmatpush3.bf16.msk.msra.mxu0 %vm953_vm11, %v952_v19  ;;  %979 = vmatpush3.bf16.msk.msra.mxu1 %vm953_vm11, %v974_v18 }
  0xac   : > { %911 = vmatmul.mubr.msk.f32.vlgmr.msra.gmra.mrb[0].mxu0 %vm399_vm0, %v285_v20  ;;  %934 = vmatmul.mubr.msk.f32.vlgmr.msra.gmra.mrb[0].mxu1 %vm399_vm0, %v285_v20 }
 0x17f   : > { %v912_v21 = vpop.f32.mrb[0].mxu0  ;;  %v935_v22 = vpop.f32.mrb[0].mxu1 }
 0x180   : > { %v668_v23 = vrot.slane %v912_v21, 4  ;;  %v665_v24 = vrot.slane %v935_v22, 4  ;;  %v472_v25 = vpop.f32.mrb[1].mxu0  ;;  %v649_v26 = vpop.f32.mrb[1].mxu1 }
 0x181   : > { %v662_v27 = vrot.slane %v472_v25, 4  ;;  %v659_v28 = vrot.slane %v649_v26, 4 }
 0x182   : > { %v673_v29 = vsel %vm670_vm12, %v912_v21, %v665_v24  ;;  %v674_v30 = vsel %vm670_vm12, %v668_v23, %v935_v22 }
 0x183   : > { %v671_v31 = vsel %vm670_vm12, %v472_v25, %v659_v28  ;;  %v672_v32 = vsel %vm670_vm12, %v662_v27, %v649_v26  ;;  %v677_v35 = vmul.f32 0.5, %v673_v29 }
 0x184   : > { %v675_v33 = vmul.f32 0.5, %v671_v31  ;;  %v676_v34 = vmul.f32 0.5, %v672_v32 }
 0x186   : > { %1094 = vtanh.f32 %v675_v33 }
 0x187   : > { %1096 = vtanh.f32 %v676_v34 }
 0x188   : > { %1098 = vtanh.f32 %v674_v30 }
 0x189   : > { %1100 = vtanh.f32 %v677_v35 }
 0x190   : > { %v1095_v36 = vpop.eup %1094 }
 0x191   : > { %v1097_v37 = vpop.eup %1096  ;;  %v681_v38 = vmul.f32 0.5, %v1095_v36 }
 0x192   : > { %v682_v39 = vmul.f32 0.5, %v1097_v37  ;;  %v1099_v42 = vpop.eup %1098 }
 0x193   : > { %v684_v40 = vadd.f32 0.5, %v681_v38  ;;  %v1101_v47 = vpop.eup %1100 }
 0x194   : > { %v685_v43 = vadd.f32 0.5, %v682_v39  ;;  %v683_v48 = vmul.f32 0.5, %v1101_v47 }
 0x195   : > { %v690_v44 = vmul.f32 %v1099_v42, %v684_v40 }
 0x196   : > { %v689_v45 = vmul.f32 %v688_v41, %v685_v43  ;;  %v686_v49 = vadd.f32 0.5, %v683_v48 }
 0x198   : > { %v691_v46 = vadd.f32 %v690_v44, %v689_v45 }
 0x19a   : > { %1102 = vtanh.f32 %v691_v46  ;;  %694 = vst [vmem:[%s283_s15] sm:$0xff] %v691_v46 }
 0x1a4   : > { %v1103_v50 = vpop.eup %1102 }
 0x1a5   : > { %v693_v51 = vmul.f32 %v1103_v50, %v686_v49 }
 0x1a7   : > { %695 = vst [vmem:[%s275_s21] sm:$0xff] %v693_v51 }
 0x1a8 PF: > { %s15_s17 = sadd.s32 1, %s1126_s17   ;;  %s1235_s15 = smov %s1122_s16 }
 0x1a9   : > { %p12_p5 = scmp.ge.s32.totalorder %s15_s17, 5   ;;  %s1236_s16 = smov %s1238_s18 }
 0x1ab   :  { %14 = sbr.rel (!%p12_p5) target bundleno = 2 (0x2), region = 78 }

</bundles_post_ra>
